<compile_context>
chip_gen: v5e
topology: v5e:2x2
jax: 0.10.0
libtpu: 0.0.40
codegen_flags: <defaults>
</compile_context>

<pallas_src>
import functools

import jax
import jax.numpy as jnp
import numpy as np
from jax.experimental import pallas as pl
from jax.experimental.pallas import tpu as pltpu

CLAMP = 0.8


# ----------------------------- Pallas kernels --------------------------------
def _invblock_kernel_vpu(x_ref, mix_ref, bias_ref, out_ref, *, c_in, s1, s2):
    """Small-C path. One (C, S_TILE, 128) slab of one batch element.

    x_ref   : VMEM (c_in, S_TILE, 128)   channels on axis 0, dense slabs below
    mix_ref : SMEM (s1+3*s2, c_in)       folded mix  [B1.T; A2.T; Bh.T; Bg.T]
    bias_ref: SMEM (s1+3*s2,)            folded bias [bF  ; 0   ; ch  ; cg ]
    out_ref : VMEM (c_in, S_TILE, 128)   output      [y1  ; y2]
    """

    def mix_row(r, add_bias=True):
        # out[s, l] = sum_c mix[r, c] * x[c, s, l] (+ bias[r])
        # SMEM scalars broadcast into VPU FMAs on full (S_TILE, 128) slabs.
        acc = x_ref[0].astype(jnp.float32) * mix_ref[r, 0]
        for c in range(1, c_in):
            acc = acc + x_ref[c].astype(jnp.float32) * mix_ref[r, c]
        if add_bias:
            acc = acc + bias_ref[r]
        return acc                                           # (S_TILE, 128) f32

    # y1 rows: compute and store immediately (no intermediate list / concat).
    for r in range(s1):
        out_ref[r] = mix_row(r).astype(out_ref.dtype)

    # y2 rows: interleave x2_r, h_r, g_r so only ~3 slabs are live at once.
    for r in range(s2):
        x2r = mix_row(s1 + r, add_bias=False)
        hr = mix_row(s1 + s2 + r)            # pre-scaled by 0.5 in the fold
        gr = mix_row(s1 + 2 * s2 + r)
        s = CLAMP * jnp.tanh(hr)             # == clamp*(2*sigmoid(2*hr) - 1)
        out_ref[s1 + r] = (x2r * jnp.exp(s) + gr).astype(out_ref.dtype)


def _invblock_kernel_mxu(x_ref, mix_ref, bias_ref, out_ref, *, s1, s2):
    """Large-C / fallback path. One (C, T) tile; mix applied on the MXU.

    x_ref   : VMEM (C, T)
    mix_ref : VMEM (s1+3*s2, C)
    bias_ref: VMEM (s1+3*s2, 1)
    out_ref : VMEM (C, T)
    """
    x = x_ref[...].astype(jnp.float32)                               # (C, T)
    z = jnp.dot(mix_ref[...], x, preferred_element_type=jnp.float32)  # (R, T)
    z = z + bias_ref[...]
    y1 = z[:s1]
    x2 = z[s1:s1 + s2]
    h = z[s1 + s2:s1 + 2 * s2]
    g = z[s1 + 2 * s2:]
    s = CLAMP * jnp.tanh(h)
    out_ref[:s1] = y1.astype(out_ref.dtype)
    out_ref[s1:] = (x2 * jnp.exp(s) + g).astype(out_ref.dtype)


# ------------------------------ tile selection --------------------------------
def _pick_tile_s(S, N, c, itemsize, max_block_bytes=2 << 20, min_steps=4):
    """Sublane tile for the (C, S, 128) layout: a multiple-of-8 divisor of S
    under the per-block byte budget; split further for grid parallelism."""
    if S % 8 != 0:
        return S  # full extent is always a legal block (tiny images)
    cap = max(8, (max_block_bytes // (c * 128 * itemsize)) // 8 * 8)
    t = (min(S, cap) // 8) * 8
    while t >= 8 and S % t != 0:
        t -= 8
    if t < 8:
        t = S
    # Give both v7x TensorCores work / allow double-buffer overlap.
    while N * (S // t) < min_steps and t % 16 == 0 and S % (t // 2) == 0:
        t //= 2
    return t


def _pick_tile_hw(HW, c, itemsize, max_block_bytes=2 << 20):
    """Lane tile for the 2-D (C, HW) layout."""
    if HW % 128 != 0:
        return HW  # full-extent block (fallback; only legal choice)
    cap = max(128, (max_block_bytes // (c * itemsize)) // 128 * 128)
    t = (min(HW, cap) // 128) * 128
    while t >= 128 and HW % t != 0:
        t -= 128
    return t if t >= 128 else HW


# ------------------------------ param folding ---------------------------------
def fold_invblock_params(params, split1):
    """Fold the invertible 1x1 conv + F/H/G 1x1 convs into one mix matrix and
    bias.  Call ONCE per parameter set; the per-forward wrapper does no math."""
    C = params["w_inv"].shape[0]
    split2 = C - split1

    # pixel-major convention: z = x_pix @ A with A = W_inv.T
    A = params["w_inv"].T                                   # (C, C)
    WF, WH, WG = params["wF"].T, params["wH"].T, params["wG"].T
    bF, bH, bG = params["bF"], params["bH"], params["bG"]

    A1, A2 = A[:, :split1], A[:, split1:]
    B1 = A1 + A2 @ WF                                       # y1 = x @ B1 + bF
    Bh = 0.5 * (B1 @ WH)                                    # h  = x @ Bh + ch
    ch = 0.5 * (bF @ WH + bH)                               #   (0.5: tanh identity)
    Bg = B1 @ WG                                            # g  = x @ Bg + cg
    cg = bF @ WG + bG

    mix = jnp.concatenate([B1.T, A2.T, Bh.T, Bg.T],
                          axis=0).astype(jnp.float32)       # (s1+3*s2, C)
    bias = jnp.concatenate(
        [bF, jnp.zeros((split2,), jnp.float32), ch, cg]).astype(jnp.float32)
    return {"mix": mix, "bias": bias, "C": C, "split1": split1, "split2": split2}


# --------------------------------- wrapper -------------------------------------
def invblock_forward(x_nchw, folded, *, io_dtype=None, max_block_bytes=2 << 20):
    N, C, H, W = x_nchw.shape
    assert C == folded["C"]
    split1, split2 = folded["split1"], folded["split2"]
    rows = split1 + 3 * split2
    HW = H * W

    x_cast = x_nchw if io_dtype is None else x_nchw.astype(io_dtype)
    out_dtype = x_cast.dtype
    itemsize = jnp.dtype(out_dtype).itemsize
    use_mxu = C >= 16

    if (not use_mxu) and HW % 128 == 0:
        # ---- small-C path: (C, S, 128) slabs, scalar-broadcast VPU FMAs ----
        S = HW // 128
        s_tile = _pick_tile_s(S, N, C, itemsize, max_block_bytes)
        assert S % s_tile == 0
        x4 = x_cast.reshape(N, C, S, 128)                   # free view
        block_bytes = C * s_tile * 128 * itemsize
        vmem_limit = int(min(max(8 * block_bytes, 8 << 20), 48 << 20))

        out = pl.pallas_call(
            functools.partial(_invblock_kernel_vpu, c_in=C, s1=split1, s2=split2),
            out_shape=jax.ShapeDtypeStruct((N, C, S, 128), out_dtype),
            grid=(N, S // s_tile),
            in_specs=[
                pl.BlockSpec((None, C, s_tile, 128), lambda n, t: (n, 0, t, 0)),
                pl.BlockSpec(memory_space=pltpu.MemorySpace.SMEM),   # mix
                pl.BlockSpec(memory_space=pltpu.MemorySpace.SMEM),   # bias
            ],
            out_specs=pl.BlockSpec((None, C, s_tile, 128),
                                   lambda n, t: (n, 0, t, 0)),
            compiler_params=pltpu.CompilerParams(
                dimension_semantics=("parallel", "parallel"),
                vmem_limit_bytes=vmem_limit),
        )(x4, folded["mix"], folded["bias"])
        return out.reshape(N, C, H, W)

    # ---- large-C path (or HW not a multiple of 128): 2-D layout + MXU dot ----
    tile_hw = _pick_tile_hw(HW, C, itemsize, max_block_bytes)
    assert HW % tile_hw == 0
    x3 = x_cast.reshape(N, C, HW)
    bias2 = folded["bias"].reshape(rows, 1)
    block_bytes = C * tile_hw * itemsize
    vmem_limit = int(min(max(8 * block_bytes, 8 << 20), 48 << 20))

    out = pl.pallas_call(
        functools.partial(_invblock_kernel_mxu, s1=split1, s2=split2),
        out_shape=jax.ShapeDtypeStruct((N, C, HW), out_dtype),
        grid=(N, HW // tile_hw),
        in_specs=[
            pl.BlockSpec((None, C, tile_hw), lambda n, t: (n, 0, t)),
            pl.BlockSpec((rows, C), lambda n, t: (0, 0)),             # mix (VMEM)
            pl.BlockSpec((rows, 1), lambda n, t: (0, 0)),             # bias (VMEM)
        ],
        out_specs=pl.BlockSpec((None, C, tile_hw), lambda n, t: (n, 0, t)),
        compiler_params=pltpu.CompilerParams(
            dimension_semantics=("parallel", "parallel"),
            vmem_limit_bytes=vmem_limit),
    )(x3, folded["mix"], bias2)
    return out.reshape(N, C, H, W)


# ------------------------- deterministic params ------------------------------
def init_params(C, split1, seed=0):
    rng = np.random.RandomState(seed)
    split2 = C - split1

    # InvertibleConv1x1 (LU_decomposed=True):  W = P @ (L @ U)
    l = (rng.randn(C, C) * 0.1).astype(np.float32)
    u = (rng.randn(C, C) * 0.1).astype(np.float32)
    log_s = (rng.randn(C) * 0.1).astype(np.float32)
    sign_s = np.where(rng.rand(C) > 0.5, 1.0, -1.0).astype(np.float32)
    perm = rng.permutation(C)
    p = np.eye(C, dtype=np.float32)[perm]
    l_mask = np.tril(np.ones((C, C), np.float32), -1)
    eye = np.eye(C, dtype=np.float32)
    L = l * l_mask + eye
    U = u * l_mask.T + np.diag(sign_s * np.exp(log_s))
    w_inv = p @ (L @ U)                      # (Cout, Cin) squeezed 1x1 weight

    def conv1x1(cin, cout):
        w = (rng.randn(cout, cin) / np.sqrt(cin)).astype(np.float32)
        b = (rng.randn(cout) * 0.1).astype(np.float32)
        return w, b

    wF, bF = conv1x1(split2, split1)   # F: C2 -> C1
    wG, bG = conv1x1(split1, split2)   # G: C1 -> C2
    wH, bH = conv1x1(split1, split2)   # H: C1 -> C2

    return {k: jnp.asarray(v) for k, v in dict(
        w_inv=w_inv, wF=wF, bF=bF, wG=wG, bG=bG, wH=wH, bH=bH).items()}


# ----------------------------- pure-JAX reference ----------------------------
def ref_forward(x_nchw, params, split1):
    N, C, H, W = x_nchw.shape
    x = jnp.transpose(x_nchw, (0, 2, 3, 1)).reshape(-1, C)
    z = x @ params["w_inv"].T
    x1, x2 = z[:, :split1], z[:, split1:]
    y1 = x1 + x2 @ params["wF"].T + params["bF"]
    s = CLAMP * (jax.nn.sigmoid(y1 @ params["wH"].T + params["bH"]) * 2.0 - 1.0)
    y2 = x2 * jnp.exp(s) + y1 @ params["wG"].T + params["bG"]
    out = jnp.concatenate([y1, y2], axis=-1)
    return out.reshape(N, H, W, C).transpose(0, 3, 1, 2)


# ---------------------------------- main --------------------------------------
if __name__ == "__main__":
    # Case 1: module config channel_num=4, channel_split_num=2  (VPU slab path)
    N, C, H, W = 2, 4, 16, 16
    split1 = 2
    x = jax.random.normal(jax.random.PRNGKey(0), (N, C, H, W), dtype=jnp.float32)
    params = init_params(C, split1, seed=0)
    folded = fold_invblock_params(params, split1)

    out = jax.block_until_ready(invblock_forward(x, folded))
    ref = ref_forward(x, params, split1)
    assert out.shape == (N, C, H, W)
    np.testing.assert_allclose(np.asarray(out), np.asarray(ref),
                               rtol=1e-2, atol=1e-2)

    # Case 2: wider channels exercising the MXU channel-mix path
    C2, split1b = 32, 16
    x2 = jax.random.normal(jax.random.PRNGKey(1), (N, C2, H, W), dtype=jnp.float32)
    params2 = init_params(C2, split1b, seed=1)
    folded2 = fold_invblock_params(params2, split1b)

    out2 = jax.block_until_ready(invblock_forward(x2, folded2))
    ref2 = ref_forward(x2, params2, split1b)
    np.testing.assert_allclose(np.asarray(out2), np.asarray(ref2),
                               rtol=1e-2, atol=1e-2)

    print("KERNEL_OK")
</pallas_src>

<mosaic_0001>
module attributes {stable_mosaic.version = 11 : i64} {
  func.func @_invblock_kernel_vpu(%arg0: i32, %arg1: i32, %arg2: memref<1x4x2x128xf32, #tpu.memory_space<vmem>>, %arg3: memref<8x4xf32, #tpu.memory_space<smem>>, %arg4: memref<8xf32, #tpu.memory_space<smem>>, %arg5: memref<1x4x2x128xf32, #tpu.memory_space<vmem>>) attributes {dimension_semantics = [#tpu.dimension_semantics<parallel>, #tpu.dimension_semantics<parallel>], iteration_bounds = array<i64: 2, 1>, scalar_prefetch = 0 : i64, scratch_operands = 0 : i64, tpu.core_type = #tpu.core_type<tc>, window_params = [{transform_indices = @transform_0, window_bounds = array<i64: 1, 4, 2, 128>}, {transform_indices = @transform_1, window_bounds = array<i64: 8, 4>}, {transform_indices = @transform_2, window_bounds = array<i64: 8>}, {transform_indices = @transform_3, window_bounds = array<i64: 1, 4, 2, 128>}]} {
    %c0 = arith.constant 0 : index
    %c0_0 = arith.constant 0 : index
    %c0_1 = arith.constant 0 : index
    %c0_2 = arith.constant 0 : index
    %0 = vector.load %arg2[%c0, %c0_0, %c0_1, %c0_2] : memref<1x4x2x128xf32, #tpu.memory_space<vmem>>, vector<1x1x2x128xf32>
    %1 = vector.shape_cast %0 : vector<1x1x2x128xf32> to vector<2x128xf32>
    %c0_3 = arith.constant 0 : index
    %c0_4 = arith.constant 0 : index
    %2 = memref.load %arg3[%c0_3, %c0_4] : memref<8x4xf32, #tpu.memory_space<smem>>
    %3 = vector.broadcast %2 : f32 to vector<2x128xf32>
    %4 = arith.mulf %1, %3 : vector<2x128xf32>
    %c0_5 = arith.constant 0 : index
    %c1 = arith.constant 1 : index
    %c0_6 = arith.constant 0 : index
    %c0_7 = arith.constant 0 : index
    %5 = vector.load %arg2[%c0_5, %c1, %c0_6, %c0_7] : memref<1x4x2x128xf32, #tpu.memory_space<vmem>>, vector<1x1x2x128xf32>
    %6 = vector.shape_cast %5 : vector<1x1x2x128xf32> to vector<2x128xf32>
    %c0_8 = arith.constant 0 : index
    %c1_9 = arith.constant 1 : index
    %7 = memref.load %arg3[%c0_8, %c1_9] : memref<8x4xf32, #tpu.memory_space<smem>>
    %8 = vector.broadcast %7 : f32 to vector<2x128xf32>
    %9 = arith.mulf %6, %8 : vector<2x128xf32>
    %10 = arith.addf %4, %9 : vector<2x128xf32>
    %c0_10 = arith.constant 0 : index
    %c2 = arith.constant 2 : index
    %c0_11 = arith.constant 0 : index
    %c0_12 = arith.constant 0 : index
    %11 = vector.load %arg2[%c0_10, %c2, %c0_11, %c0_12] : memref<1x4x2x128xf32, #tpu.memory_space<vmem>>, vector<1x1x2x128xf32>
    %12 = vector.shape_cast %11 : vector<1x1x2x128xf32> to vector<2x128xf32>
    %c0_13 = arith.constant 0 : index
    %c2_14 = arith.constant 2 : index
    %13 = memref.load %arg3[%c0_13, %c2_14] : memref<8x4xf32, #tpu.memory_space<smem>>
    %14 = vector.broadcast %13 : f32 to vector<2x128xf32>
    %15 = arith.mulf %12, %14 : vector<2x128xf32>
    %16 = arith.addf %10, %15 : vector<2x128xf32>
    %c0_15 = arith.constant 0 : index
    %c3 = arith.constant 3 : index
    %c0_16 = arith.constant 0 : index
    %c0_17 = arith.constant 0 : index
    %17 = vector.load %arg2[%c0_15, %c3, %c0_16, %c0_17] : memref<1x4x2x128xf32, #tpu.memory_space<vmem>>, vector<1x1x2x128xf32>
    %18 = vector.shape_cast %17 : vector<1x1x2x128xf32> to vector<2x128xf32>
    %c0_18 = arith.constant 0 : index
    %c3_19 = arith.constant 3 : index
    %19 = memref.load %arg3[%c0_18, %c3_19] : memref<8x4xf32, #tpu.memory_space<smem>>
    %20 = vector.broadcast %19 : f32 to vector<2x128xf32>
    %21 = arith.mulf %18, %20 : vector<2x128xf32>
    %22 = arith.addf %16, %21 : vector<2x128xf32>
    %c0_20 = arith.constant 0 : index
    %23 = memref.load %arg4[%c0_20] : memref<8xf32, #tpu.memory_space<smem>>
    %24 = vector.broadcast %23 : f32 to vector<2x128xf32>
    %25 = arith.addf %22, %24 : vector<2x128xf32>
    %c0_21 = arith.constant 0 : index
    %c0_22 = arith.constant 0 : index
    %c0_23 = arith.constant 0 : index
    %c0_24 = arith.constant 0 : index
    %26 = vector.load %arg5[%c0_21, %c0_22, %c0_23, %c0_24] : memref<1x4x2x128xf32, #tpu.memory_space<vmem>>, vector<1x1x2x128xf32>
    %27 = vector.shape_cast %26 : vector<1x1x2x128xf32> to vector<2x128xf32>
    %28 = vector.shape_cast %25 : vector<2x128xf32> to vector<1x1x2x128xf32>
    tpu.vector_store %arg5[%c0_21, %c0_22, %c0_23, %c0_24], %28 {strides = array<i32>} : memref<1x4x2x128xf32, #tpu.memory_space<vmem>>, vector<1x1x2x128xf32>,
    %c0_25 = arith.constant 0 : index
    %c0_26 = arith.constant 0 : index
    %c0_27 = arith.constant 0 : index
    %c0_28 = arith.constant 0 : index
    %29 = vector.load %arg2[%c0_25, %c0_26, %c0_27, %c0_28] : memref<1x4x2x128xf32, #tpu.memory_space<vmem>>, vector<1x1x2x128xf32>
    %30 = vector.shape_cast %29 : vector<1x1x2x128xf32> to vector<2x128xf32>
    %c1_29 = arith.constant 1 : index
    %c0_30 = arith.constant 0 : index
    %31 = memref.load %arg3[%c1_29, %c0_30] : memref<8x4xf32, #tpu.memory_space<smem>>
    %32 = vector.broadcast %31 : f32 to vector<2x128xf32>
    %33 = arith.mulf %30, %32 : vector<2x128xf32>
    %c0_31 = arith.constant 0 : index
    %c1_32 = arith.constant 1 : index
    %c0_33 = arith.constant 0 : index
    %c0_34 = arith.constant 0 : index
    %34 = vector.load %arg2[%c0_31, %c1_32, %c0_33, %c0_34] : memref<1x4x2x128xf32, #tpu.memory_space<vmem>>, vector<1x1x2x128xf32>
    %35 = vector.shape_cast %34 : vector<1x1x2x128xf32> to vector<2x128xf32>
    %c1_35 = arith.constant 1 : index
    %c1_36 = arith.constant 1 : index
    %36 = memref.load %arg3[%c1_35, %c1_36] : memref<8x4xf32, #tpu.memory_space<smem>>
    %37 = vector.broadcast %36 : f32 to vector<2x128xf32>
    %38 = arith.mulf %35, %37 : vector<2x128xf32>
    %39 = arith.addf %33, %38 : vector<2x128xf32>
    %c0_37 = arith.constant 0 : index
    %c2_38 = arith.constant 2 : index
    %c0_39 = arith.constant 0 : index
    %c0_40 = arith.constant 0 : index
    %40 = vector.load %arg2[%c0_37, %c2_38, %c0_39, %c0_40] : memref<1x4x2x128xf32, #tpu.memory_space<vmem>>, vector<1x1x2x128xf32>
    %41 = vector.shape_cast %40 : vector<1x1x2x128xf32> to vector<2x128xf32>
    %c1_41 = arith.constant 1 : index
    %c2_42 = arith.constant 2 : index
    %42 = memref.load %arg3[%c1_41, %c2_42] : memref<8x4xf32, #tpu.memory_space<smem>>
    %43 = vector.broadcast %42 : f32 to vector<2x128xf32>
    %44 = arith.mulf %41, %43 : vector<2x128xf32>
    %45 = arith.addf %39, %44 : vector<2x128xf32>
    %c0_43 = arith.constant 0 : index
    %c3_44 = arith.constant 3 : index
    %c0_45 = arith.constant 0 : index
    %c0_46 = arith.constant 0 : index
    %46 = vector.load %arg2[%c0_43, %c3_44, %c0_45, %c0_46] : memref<1x4x2x128xf32, #tpu.memory_space<vmem>>, vector<1x1x2x128xf32>
    %47 = vector.shape_cast %46 : vector<1x1x2x128xf32> to vector<2x128xf32>
    %c1_47 = arith.constant 1 : index
    %c3_48 = arith.constant 3 : index
    %48 = memref.load %arg3[%c1_47, %c3_48] : memref<8x4xf32, #tpu.memory_space<smem>>
    %49 = vector.broadcast %48 : f32 to vector<2x128xf32>
    %50 = arith.mulf %47, %49 : vector<2x128xf32>
    %51 = arith.addf %45, %50 : vector<2x128xf32>
    %c1_49 = arith.constant 1 : index
    %52 = memref.load %arg4[%c1_49] : memref<8xf32, #tpu.memory_space<smem>>
    %53 = vector.broadcast %52 : f32 to vector<2x128xf32>
    %54 = arith.addf %51, %53 : vector<2x128xf32>
    %c0_50 = arith.constant 0 : index
    %c1_51 = arith.constant 1 : index
    %c0_52 = arith.constant 0 : index
    %c0_53 = arith.constant 0 : index
    %55 = vector.load %arg5[%c0_50, %c1_51, %c0_52, %c0_53] : memref<1x4x2x128xf32, #tpu.memory_space<vmem>>, vector<1x1x2x128xf32>
    %56 = vector.shape_cast %55 : vector<1x1x2x128xf32> to vector<2x128xf32>
    %57 = vector.shape_cast %54 : vector<2x128xf32> to vector<1x1x2x128xf32>
    tpu.vector_store %arg5[%c0_50, %c1_51, %c0_52, %c0_53], %57 {strides = array<i32>} : memref<1x4x2x128xf32, #tpu.memory_space<vmem>>, vector<1x1x2x128xf32>,
    %c0_54 = arith.constant 0 : index
    %c0_55 = arith.constant 0 : index
    %c0_56 = arith.constant 0 : index
    %c0_57 = arith.constant 0 : index
    %58 = vector.load %arg2[%c0_54, %c0_55, %c0_56, %c0_57] : memref<1x4x2x128xf32, #tpu.memory_space<vmem>>, vector<1x1x2x128xf32>
    %59 = vector.shape_cast %58 : vector<1x1x2x128xf32> to vector<2x128xf32>
    %c2_58 = arith.constant 2 : index
    %c0_59 = arith.constant 0 : index
    %60 = memref.load %arg3[%c2_58, %c0_59] : memref<8x4xf32, #tpu.memory_space<smem>>
    %61 = vector.broadcast %60 : f32 to vector<2x128xf32>
    %62 = arith.mulf %59, %61 : vector<2x128xf32>
    %c0_60 = arith.constant 0 : index
    %c1_61 = arith.constant 1 : index
    %c0_62 = arith.constant 0 : index
    %c0_63 = arith.constant 0 : index
    %63 = vector.load %arg2[%c0_60, %c1_61, %c0_62, %c0_63] : memref<1x4x2x128xf32, #tpu.memory_space<vmem>>, vector<1x1x2x128xf32>
    %64 = vector.shape_cast %63 : vector<1x1x2x128xf32> to vector<2x128xf32>
    %c2_64 = arith.constant 2 : index
    %c1_65 = arith.constant 1 : index
    %65 = memref.load %arg3[%c2_64, %c1_65] : memref<8x4xf32, #tpu.memory_space<smem>>
    %66 = vector.broadcast %65 : f32 to vector<2x128xf32>
    %67 = arith.mulf %64, %66 : vector<2x128xf32>
    %68 = arith.addf %62, %67 : vector<2x128xf32>
    %c0_66 = arith.constant 0 : index
    %c2_67 = arith.constant 2 : index
    %c0_68 = arith.constant 0 : index
    %c0_69 = arith.constant 0 : index
    %69 = vector.load %arg2[%c0_66, %c2_67, %c0_68, %c0_69] : memref<1x4x2x128xf32, #tpu.memory_space<vmem>>, vector<1x1x2x128xf32>
    %70 = vector.shape_cast %69 : vector<1x1x2x128xf32> to vector<2x128xf32>
    %c2_70 = arith.constant 2 : index
    %c2_71 = arith.constant 2 : index
    %71 = memref.load %arg3[%c2_70, %c2_71] : memref<8x4xf32, #tpu.memory_space<smem>>
    %72 = vector.broadcast %71 : f32 to vector<2x128xf32>
    %73 = arith.mulf %70, %72 : vector<2x128xf32>
    %74 = arith.addf %68, %73 : vector<2x128xf32>
    %c0_72 = arith.constant 0 : index
    %c3_73 = arith.constant 3 : index
    %c0_74 = arith.constant 0 : index
    %c0_75 = arith.constant 0 : index
    %75 = vector.load %arg2[%c0_72, %c3_73, %c0_74, %c0_75] : memref<1x4x2x128xf32, #tpu.memory_space<vmem>>, vector<1x1x2x128xf32>
    %76 = vector.shape_cast %75 : vector<1x1x2x128xf32> to vector<2x128xf32>
    %c2_76 = arith.constant 2 : index
    %c3_77 = arith.constant 3 : index
    %77 = memref.load %arg3[%c2_76, %c3_77] : memref<8x4xf32, #tpu.memory_space<smem>>
    %78 = vector.broadcast %77 : f32 to vector<2x128xf32>
    %79 = arith.mulf %76, %78 : vector<2x128xf32>
    %80 = arith.addf %74, %79 : vector<2x128xf32>
    %c0_78 = arith.constant 0 : index
    %c0_79 = arith.constant 0 : index
    %c0_80 = arith.constant 0 : index
    %c0_81 = arith.constant 0 : index
    %81 = vector.load %arg2[%c0_78, %c0_79, %c0_80, %c0_81] : memref<1x4x2x128xf32, #tpu.memory_space<vmem>>, vector<1x1x2x128xf32>
    %82 = vector.shape_cast %81 : vector<1x1x2x128xf32> to vector<2x128xf32>
    %c4 = arith.constant 4 : index
    %c0_82 = arith.constant 0 : index
    %83 = memref.load %arg3[%c4, %c0_82] : memref<8x4xf32, #tpu.memory_space<smem>>
    %84 = vector.broadcast %83 : f32 to vector<2x128xf32>
    %85 = arith.mulf %82, %84 : vector<2x128xf32>
    %c0_83 = arith.constant 0 : index
    %c1_84 = arith.constant 1 : index
    %c0_85 = arith.constant 0 : index
    %c0_86 = arith.constant 0 : index
    %86 = vector.load %arg2[%c0_83, %c1_84, %c0_85, %c0_86] : memref<1x4x2x128xf32, #tpu.memory_space<vmem>>, vector<1x1x2x128xf32>
    %87 = vector.shape_cast %86 : vector<1x1x2x128xf32> to vector<2x128xf32>
    %c4_87 = arith.constant 4 : index
    %c1_88 = arith.constant 1 : index
    %88 = memref.load %arg3[%c4_87, %c1_88] : memref<8x4xf32, #tpu.memory_space<smem>>
    %89 = vector.broadcast %88 : f32 to vector<2x128xf32>
    %90 = arith.mulf %87, %89 : vector<2x128xf32>
    %91 = arith.addf %85, %90 : vector<2x128xf32>
    %c0_89 = arith.constant 0 : index
    %c2_90 = arith.constant 2 : index
    %c0_91 = arith.constant 0 : index
    %c0_92 = arith.constant 0 : index
    %92 = vector.load %arg2[%c0_89, %c2_90, %c0_91, %c0_92] : memref<1x4x2x128xf32, #tpu.memory_space<vmem>>, vector<1x1x2x128xf32>
    %93 = vector.shape_cast %92 : vector<1x1x2x128xf32> to vector<2x128xf32>
    %c4_93 = arith.constant 4 : index
    %c2_94 = arith.constant 2 : index
    %94 = memref.load %arg3[%c4_93, %c2_94] : memref<8x4xf32, #tpu.memory_space<smem>>
    %95 = vector.broadcast %94 : f32 to vector<2x128xf32>
    %96 = arith.mulf %93, %95 : vector<2x128xf32>
    %97 = arith.addf %91, %96 : vector<2x128xf32>
    %c0_95 = arith.constant 0 : index
    %c3_96 = arith.constant 3 : index
    %c0_97 = arith.constant 0 : index
    %c0_98 = arith.constant 0 : index
    %98 = vector.load %arg2[%c0_95, %c3_96, %c0_97, %c0_98] : memref<1x4x2x128xf32, #tpu.memory_space<vmem>>, vector<1x1x2x128xf32>
    %99 = vector.shape_cast %98 : vector<1x1x2x128xf32> to vector<2x128xf32>
    %c4_99 = arith.constant 4 : index
    %c3_100 = arith.constant 3 : index
    %100 = memref.load %arg3[%c4_99, %c3_100] : memref<8x4xf32, #tpu.memory_space<smem>>
    %101 = vector.broadcast %100 : f32 to vector<2x128xf32>
    %102 = arith.mulf %99, %101 : vector<2x128xf32>
    %103 = arith.addf %97, %102 : vector<2x128xf32>
    %c4_101 = arith.constant 4 : index
    %104 = memref.load %arg4[%c4_101] : memref<8xf32, #tpu.memory_space<smem>>
    %105 = vector.broadcast %104 : f32 to vector<2x128xf32>
    %106 = arith.addf %103, %105 : vector<2x128xf32>
    %c0_102 = arith.constant 0 : index
    %c0_103 = arith.constant 0 : index
    %c0_104 = arith.constant 0 : index
    %c0_105 = arith.constant 0 : index
    %107 = vector.load %arg2[%c0_102, %c0_103, %c0_104, %c0_105] : memref<1x4x2x128xf32, #tpu.memory_space<vmem>>, vector<1x1x2x128xf32>
    %108 = vector.shape_cast %107 : vector<1x1x2x128xf32> to vector<2x128xf32>
    %c6 = arith.constant 6 : index
    %c0_106 = arith.constant 0 : index
    %109 = memref.load %arg3[%c6, %c0_106] : memref<8x4xf32, #tpu.memory_space<smem>>
    %110 = vector.broadcast %109 : f32 to vector<2x128xf32>
    %111 = arith.mulf %108, %110 : vector<2x128xf32>
    %c0_107 = arith.constant 0 : index
    %c1_108 = arith.constant 1 : index
    %c0_109 = arith.constant 0 : index
    %c0_110 = arith.constant 0 : index
    %112 = vector.load %arg2[%c0_107, %c1_108, %c0_109, %c0_110] : memref<1x4x2x128xf32, #tpu.memory_space<vmem>>, vector<1x1x2x128xf32>
    %113 = vector.shape_cast %112 : vector<1x1x2x128xf32> to vector<2x128xf32>
    %c6_111 = arith.constant 6 : index
    %c1_112 = arith.constant 1 : index
    %114 = memref.load %arg3[%c6_111, %c1_112] : memref<8x4xf32, #tpu.memory_space<smem>>
    %115 = vector.broadcast %114 : f32 to vector<2x128xf32>
    %116 = arith.mulf %113, %115 : vector<2x128xf32>
    %117 = arith.addf %111, %116 : vector<2x128xf32>
    %c0_113 = arith.constant 0 : index
    %c2_114 = arith.constant 2 : index
    %c0_115 = arith.constant 0 : index
    %c0_116 = arith.constant 0 : index
    %118 = vector.load %arg2[%c0_113, %c2_114, %c0_115, %c0_116] : memref<1x4x2x128xf32, #tpu.memory_space<vmem>>, vector<1x1x2x128xf32>
    %119 = vector.shape_cast %118 : vector<1x1x2x128xf32> to vector<2x128xf32>
    %c6_117 = arith.constant 6 : index
    %c2_118 = arith.constant 2 : index
    %120 = memref.load %arg3[%c6_117, %c2_118] : memref<8x4xf32, #tpu.memory_space<smem>>
    %121 = vector.broadcast %120 : f32 to vector<2x128xf32>
    %122 = arith.mulf %119, %121 : vector<2x128xf32>
    %123 = arith.addf %117, %122 : vector<2x128xf32>
    %c0_119 = arith.constant 0 : index
    %c3_120 = arith.constant 3 : index
    %c0_121 = arith.constant 0 : index
    %c0_122 = arith.constant 0 : index
    %124 = vector.load %arg2[%c0_119, %c3_120, %c0_121, %c0_122] : memref<1x4x2x128xf32, #tpu.memory_space<vmem>>, vector<1x1x2x128xf32>
    %125 = vector.shape_cast %124 : vector<1x1x2x128xf32> to vector<2x128xf32>
    %c6_123 = arith.constant 6 : index
    %c3_124 = arith.constant 3 : index
    %126 = memref.load %arg3[%c6_123, %c3_124] : memref<8x4xf32, #tpu.memory_space<smem>>
    %127 = vector.broadcast %126 : f32 to vector<2x128xf32>
    %128 = arith.mulf %125, %127 : vector<2x128xf32>
    %129 = arith.addf %123, %128 : vector<2x128xf32>
    %c6_125 = arith.constant 6 : index
    %130 = memref.load %arg4[%c6_125] : memref<8xf32, #tpu.memory_space<smem>>
    %131 = vector.broadcast %130 : f32 to vector<2x128xf32>
    %132 = arith.addf %129, %131 : vector<2x128xf32>
    %133 = math.tanh %106 : vector<2x128xf32>
    %cst = arith.constant 8.000000e-01 : f32
    %134 = vector.broadcast %cst : f32 to vector<2x128xf32>
    %135 = arith.mulf %134, %133 : vector<2x128xf32>
    %136 = math.exp %135 : vector<2x128xf32>
    %137 = arith.mulf %80, %136 : vector<2x128xf32>
    %138 = arith.addf %137, %132 : vector<2x128xf32>
    %c0_126 = arith.constant 0 : index
    %c2_127 = arith.constant 2 : index
    %c0_128 = arith.constant 0 : index
    %c0_129 = arith.constant 0 : index
    %139 = vector.load %arg5[%c0_126, %c2_127, %c0_128, %c0_129] : memref<1x4x2x128xf32, #tpu.memory_space<vmem>>, vector<1x1x2x128xf32>
    %140 = vector.shape_cast %139 : vector<1x1x2x128xf32> to vector<2x128xf32>
    %141 = vector.shape_cast %138 : vector<2x128xf32> to vector<1x1x2x128xf32>
    tpu.vector_store %arg5[%c0_126, %c2_127, %c0_128, %c0_129], %141 {strides = array<i32>} : memref<1x4x2x128xf32, #tpu.memory_space<vmem>>, vector<1x1x2x128xf32>,
    %c0_130 = arith.constant 0 : index
    %c0_131 = arith.constant 0 : index
    %c0_132 = arith.constant 0 : index
    %c0_133 = arith.constant 0 : index
    %142 = vector.load %arg2[%c0_130, %c0_131, %c0_132, %c0_133] : memref<1x4x2x128xf32, #tpu.memory_space<vmem>>, vector<1x1x2x128xf32>
    %143 = vector.shape_cast %142 : vector<1x1x2x128xf32> to vector<2x128xf32>
    %c3_134 = arith.constant 3 : index
    %c0_135 = arith.constant 0 : index
    %144 = memref.load %arg3[%c3_134, %c0_135] : memref<8x4xf32, #tpu.memory_space<smem>>
    %145 = vector.broadcast %144 : f32 to vector<2x128xf32>
    %146 = arith.mulf %143, %145 : vector<2x128xf32>
    %c0_136 = arith.constant 0 : index
    %c1_137 = arith.constant 1 : index
    %c0_138 = arith.constant 0 : index
    %c0_139 = arith.constant 0 : index
    %147 = vector.load %arg2[%c0_136, %c1_137, %c0_138, %c0_139] : memref<1x4x2x128xf32, #tpu.memory_space<vmem>>, vector<1x1x2x128xf32>
    %148 = vector.shape_cast %147 : vector<1x1x2x128xf32> to vector<2x128xf32>
    %c3_140 = arith.constant 3 : index
    %c1_141 = arith.constant 1 : index
    %149 = memref.load %arg3[%c3_140, %c1_141] : memref<8x4xf32, #tpu.memory_space<smem>>
    %150 = vector.broadcast %149 : f32 to vector<2x128xf32>
    %151 = arith.mulf %148, %150 : vector<2x128xf32>
    %152 = arith.addf %146, %151 : vector<2x128xf32>
    %c0_142 = arith.constant 0 : index
    %c2_143 = arith.constant 2 : index
    %c0_144 = arith.constant 0 : index
    %c0_145 = arith.constant 0 : index
    %153 = vector.load %arg2[%c0_142, %c2_143, %c0_144, %c0_145] : memref<1x4x2x128xf32, #tpu.memory_space<vmem>>, vector<1x1x2x128xf32>
    %154 = vector.shape_cast %153 : vector<1x1x2x128xf32> to vector<2x128xf32>
    %c3_146 = arith.constant 3 : index
    %c2_147 = arith.constant 2 : index
    %155 = memref.load %arg3[%c3_146, %c2_147] : memref<8x4xf32, #tpu.memory_space<smem>>
    %156 = vector.broadcast %155 : f32 to vector<2x128xf32>
    %157 = arith.mulf %154, %156 : vector<2x128xf32>
    %158 = arith.addf %152, %157 : vector<2x128xf32>
    %c0_148 = arith.constant 0 : index
    %c3_149 = arith.constant 3 : index
    %c0_150 = arith.constant 0 : index
    %c0_151 = arith.constant 0 : index
    %159 = vector.load %arg2[%c0_148, %c3_149, %c0_150, %c0_151] : memref<1x4x2x128xf32, #tpu.memory_space<vmem>>, vector<1x1x2x128xf32>
    %160 = vector.shape_cast %159 : vector<1x1x2x128xf32> to vector<2x128xf32>
    %c3_152 = arith.constant 3 : index
    %c3_153 = arith.constant 3 : index
    %161 = memref.load %arg3[%c3_152, %c3_153] : memref<8x4xf32, #tpu.memory_space<smem>>
    %162 = vector.broadcast %161 : f32 to vector<2x128xf32>
    %163 = arith.mulf %160, %162 : vector<2x128xf32>
    %164 = arith.addf %158, %163 : vector<2x128xf32>
    %c0_154 = arith.constant 0 : index
    %c0_155 = arith.constant 0 : index
    %c0_156 = arith.constant 0 : index
    %c0_157 = arith.constant 0 : index
    %165 = vector.load %arg2[%c0_154, %c0_155, %c0_156, %c0_157] : memref<1x4x2x128xf32, #tpu.memory_space<vmem>>, vector<1x1x2x128xf32>
    %166 = vector.shape_cast %165 : vector<1x1x2x128xf32> to vector<2x128xf32>
    %c5 = arith.constant 5 : index
    %c0_158 = arith.constant 0 : index
    %167 = memref.load %arg3[%c5, %c0_158] : memref<8x4xf32, #tpu.memory_space<smem>>
    %168 = vector.broadcast %167 : f32 to vector<2x128xf32>
    %169 = arith.mulf %166, %168 : vector<2x128xf32>
    %c0_159 = arith.constant 0 : index
    %c1_160 = arith.constant 1 : index
    %c0_161 = arith.constant 0 : index
    %c0_162 = arith.constant 0 : index
    %170 = vector.load %arg2[%c0_159, %c1_160, %c0_161, %c0_162] : memref<1x4x2x128xf32, #tpu.memory_space<vmem>>, vector<1x1x2x128xf32>
    %171 = vector.shape_cast %170 : vector<1x1x2x128xf32> to vector<2x128xf32>
    %c5_163 = arith.constant 5 : index
    %c1_164 = arith.constant 1 : index
    %172 = memref.load %arg3[%c5_163, %c1_164] : memref<8x4xf32, #tpu.memory_space<smem>>
    %173 = vector.broadcast %172 : f32 to vector<2x128xf32>
    %174 = arith.mulf %171, %173 : vector<2x128xf32>
    %175 = arith.addf %169, %174 : vector<2x128xf32>
    %c0_165 = arith.constant 0 : index
    %c2_166 = arith.constant 2 : index
    %c0_167 = arith.constant 0 : index
    %c0_168 = arith.constant 0 : index
    %176 = vector.load %arg2[%c0_165, %c2_166, %c0_167, %c0_168] : memref<1x4x2x128xf32, #tpu.memory_space<vmem>>, vector<1x1x2x128xf32>
    %177 = vector.shape_cast %176 : vector<1x1x2x128xf32> to vector<2x128xf32>
    %c5_169 = arith.constant 5 : index
    %c2_170 = arith.constant 2 : index
    %178 = memref.load %arg3[%c5_169, %c2_170] : memref<8x4xf32, #tpu.memory_space<smem>>
    %179 = vector.broadcast %178 : f32 to vector<2x128xf32>
    %180 = arith.mulf %177, %179 : vector<2x128xf32>
    %181 = arith.addf %175, %180 : vector<2x128xf32>
    %c0_171 = arith.constant 0 : index
    %c3_172 = arith.constant 3 : index
    %c0_173 = arith.constant 0 : index
    %c0_174 = arith.constant 0 : index
    %182 = vector.load %arg2[%c0_171, %c3_172, %c0_173, %c0_174] : memref<1x4x2x128xf32, #tpu.memory_space<vmem>>, vector<1x1x2x128xf32>
    %183 = vector.shape_cast %182 : vector<1x1x2x128xf32> to vector<2x128xf32>
    %c5_175 = arith.constant 5 : index
    %c3_176 = arith.constant 3 : index
    %184 = memref.load %arg3[%c5_175, %c3_176] : memref<8x4xf32, #tpu.memory_space<smem>>
    %185 = vector.broadcast %184 : f32 to vector<2x128xf32>
    %186 = arith.mulf %183, %185 : vector<2x128xf32>
    %187 = arith.addf %181, %186 : vector<2x128xf32>
    %c5_177 = arith.constant 5 : index
    %188 = memref.load %arg4[%c5_177] : memref<8xf32, #tpu.memory_space<smem>>
    %189 = vector.broadcast %188 : f32 to vector<2x128xf32>
    %190 = arith.addf %187, %189 : vector<2x128xf32>
    %c0_178 = arith.constant 0 : index
    %c0_179 = arith.constant 0 : index
    %c0_180 = arith.constant 0 : index
    %c0_181 = arith.constant 0 : index
    %191 = vector.load %arg2[%c0_178, %c0_179, %c0_180, %c0_181] : memref<1x4x2x128xf32, #tpu.memory_space<vmem>>, vector<1x1x2x128xf32>
    %192 = vector.shape_cast %191 : vector<1x1x2x128xf32> to vector<2x128xf32>
    %c7 = arith.constant 7 : index
    %c0_182 = arith.constant 0 : index
    %193 = memref.load %arg3[%c7, %c0_182] : memref<8x4xf32, #tpu.memory_space<smem>>
    %194 = vector.broadcast %193 : f32 to vector<2x128xf32>
    %195 = arith.mulf %192, %194 : vector<2x128xf32>
    %c0_183 = arith.constant 0 : index
    %c1_184 = arith.constant 1 : index
    %c0_185 = arith.constant 0 : index
    %c0_186 = arith.constant 0 : index
    %196 = vector.load %arg2[%c0_183, %c1_184, %c0_185, %c0_186] : memref<1x4x2x128xf32, #tpu.memory_space<vmem>>, vector<1x1x2x128xf32>
    %197 = vector.shape_cast %196 : vector<1x1x2x128xf32> to vector<2x128xf32>
    %c7_187 = arith.constant 7 : index
    %c1_188 = arith.constant 1 : index
    %198 = memref.load %arg3[%c7_187, %c1_188] : memref<8x4xf32, #tpu.memory_space<smem>>
    %199 = vector.broadcast %198 : f32 to vector<2x128xf32>
    %200 = arith.mulf %197, %199 : vector<2x128xf32>
    %201 = arith.addf %195, %200 : vector<2x128xf32>
    %c0_189 = arith.constant 0 : index
    %c2_190 = arith.constant 2 : index
    %c0_191 = arith.constant 0 : index
    %c0_192 = arith.constant 0 : index
    %202 = vector.load %arg2[%c0_189, %c2_190, %c0_191, %c0_192] : memref<1x4x2x128xf32, #tpu.memory_space<vmem>>, vector<1x1x2x128xf32>
    %203 = vector.shape_cast %202 : vector<1x1x2x128xf32> to vector<2x128xf32>
    %c7_193 = arith.constant 7 : index
    %c2_194 = arith.constant 2 : index
    %204 = memref.load %arg3[%c7_193, %c2_194] : memref<8x4xf32, #tpu.memory_space<smem>>
    %205 = vector.broadcast %204 : f32 to vector<2x128xf32>
    %206 = arith.mulf %203, %205 : vector<2x128xf32>
    %207 = arith.addf %201, %206 : vector<2x128xf32>
    %c0_195 = arith.constant 0 : index
    %c3_196 = arith.constant 3 : index
    %c0_197 = arith.constant 0 : index
    %c0_198 = arith.constant 0 : index
    %208 = vector.load %arg2[%c0_195, %c3_196, %c0_197, %c0_198] : memref<1x4x2x128xf32, #tpu.memory_space<vmem>>, vector<1x1x2x128xf32>
    %209 = vector.shape_cast %208 : vector<1x1x2x128xf32> to vector<2x128xf32>
    %c7_199 = arith.constant 7 : index
    %c3_200 = arith.constant 3 : index
    %210 = memref.load %arg3[%c7_199, %c3_200] : memref<8x4xf32, #tpu.memory_space<smem>>
    %211 = vector.broadcast %210 : f32 to vector<2x128xf32>
    %212 = arith.mulf %209, %211 : vector<2x128xf32>
    %213 = arith.addf %207, %212 : vector<2x128xf32>
    %c7_201 = arith.constant 7 : index
    %214 = memref.load %arg4[%c7_201] : memref<8xf32, #tpu.memory_space<smem>>
    %215 = vector.broadcast %214 : f32 to vector<2x128xf32>
    %216 = arith.addf %213, %215 : vector<2x128xf32>
    %217 = math.tanh %190 : vector<2x128xf32>
    %cst_202 = arith.constant 8.000000e-01 : f32
    %218 = vector.broadcast %cst_202 : f32 to vector<2x128xf32>
    %219 = arith.mulf %218, %217 : vector<2x128xf32>
    %220 = math.exp %219 : vector<2x128xf32>
    %221 = arith.mulf %164, %220 : vector<2x128xf32>
    %222 = arith.addf %221, %216 : vector<2x128xf32>
    %c0_203 = arith.constant 0 : index
    %c3_204 = arith.constant 3 : index
    %c0_205 = arith.constant 0 : index
    %c0_206 = arith.constant 0 : index
    %223 = vector.load %arg5[%c0_203, %c3_204, %c0_205, %c0_206] : memref<1x4x2x128xf32, #tpu.memory_space<vmem>>, vector<1x1x2x128xf32>
    %224 = vector.shape_cast %223 : vector<1x1x2x128xf32> to vector<2x128xf32>
    %225 = vector.shape_cast %222 : vector<2x128xf32> to vector<1x1x2x128xf32>
    tpu.vector_store %arg5[%c0_203, %c3_204, %c0_205, %c0_206], %225 {strides = array<i32>} : memref<1x4x2x128xf32, #tpu.memory_space<vmem>>, vector<1x1x2x128xf32>,
    return
  }
  func.func @transform_0(%arg0: i32, %arg1: i32) -> (i32, i32, i32, i32) {
    %c0_i32 = arith.constant 0 : i32
    %c0_i32_0 = arith.constant 0 : i32
    %c0_i32_1 = arith.constant 0 : i32
    return %arg0, %c0_i32, %arg1, %c0_i32_0 : i32, i32, i32, i32
  }
  func.func @transform_1(%arg0: i32, %arg1: i32) -> (i32, i32) {
    %c0_i32 = arith.constant 0 : i32
    %c0_i32_0 = arith.constant 0 : i32
    %c0_i32_1 = arith.constant 0 : i32
    return %c0_i32, %c0_i32_0 : i32, i32
  }
  func.func @transform_2(%arg0: i32, %arg1: i32) -> i32 {
    %c0_i32 = arith.constant 0 : i32
    %c0_i32_0 = arith.constant 0 : i32
    return %c0_i32 : i32
  }
  func.func @transform_3(%arg0: i32, %arg1: i32) -> (i32, i32, i32, i32) {
    %c0_i32 = arith.constant 0 : i32
    %c0_i32_0 = arith.constant 0 : i32
    %c0_i32_1 = arith.constant 0 : i32
    return %arg0, %c0_i32, %arg1, %c0_i32_0 : i32, i32, i32, i32
  }
}

</mosaic_0001>

<bundles_post_ra>
// kernel: tpu_custom_call.1
= control target key start
LH: loop header
LB: loop body
LE: loop exit
PB: predicated region body
PF: predicated region fallthrough
CT: control target
= control target key end

     0   :  { %s1128_s0 = inlined_call_operand.hbm [shape: f32[2,4,2,128], index: 0, kind: input, shape index: {}]   ;;  %s1129_s1 = inlined_call_operand.vmem [shape: f32[8,4], index: 1, kind: input, shape index: {}]   ;;  %s1130_s2 = inlined_call_operand.vmem [shape: f32[8], index: 2, kind: input, shape index: {}]   ;;  %s1131_s3 = inlined_call_operand.hbm [shape: f32[2,4,2,128], index: 3, kind: output, shape index: {}]  }
   0x1   :  { %1132 = sst [smem:[#allocation14_spill]] %s1129_s1 }
   0x2   :  { %8 = vsyncpa [#allocation3], 0 }
   0x3   :  { %10 = vsyncpa [#allocation3 + $0x1], 0 }
   0x4   :  { %11 = vsyncpa [#allocation5], 0 }
   0x5   :  { %12 = vsyncpa [#allocation8], 0 }
   0x6   :  { %13 = vsyncpa [#allocation4], 0 }
   0x7   :  { %15 = vsyncpa [#allocation4 + $0x1], 0  ;;  %s880_s12 = smov 0   ;;  %s882_s13 = smov 0  }
   0x8   :  { %s884_s14 = smov 0   ;;  %s886_s15 = smov 0  }
   0x9   :  { %s888_s16 = smov 0   ;;  %s890_s17 = smov 0  }
   0xa LB: > { %s535_s18 = sadd.s32 4294967295, %s852_s17   ;;  %s536_s19 = sadd.s32 4294967294, %s852_s17   ;;  %s852_s17 = sphi %s890_s17, %s21_s17   ;;  %s848_s16 = sphi %s888_s16, %s1145_s16   ;;  %s844_s15 = sphi %s886_s15, %s1144_s15   ;;  %s840_s14 = sphi %s884_s14, %s1143_s14   ;;  %s836_s13 = sphi %s882_s13, %s1142_s13   ;;  %s832_s12 = sphi %s880_s12, %s1141_s12  }
   0xb   : > { %s42_s20 = sadd.s32 1, %s840_s14  ;;  %p49_p0 = scmp.ne.s32.totalorder %s840_s14, %s836_s13 }
   0xc   : > { %p50_p1 = scmp.eq.s32.totalorder %s852_s17, 0  ;;  %p55_p2 = scmp.ne.s32.totalorder %s836_s13, %s832_s12 }
   0xd   : > { %p918_p3 = scmp.eq.s32.totalorder %s535_s18, 0  ;;  %p123_p4 = scmp.eq.s32.totalorder %s535_s18, 1 }
   0xe   : > { %p922_p5 = por %p50_p1, %p49_p0  ;;  %p129_p6 = scmp.eq.s32.totalorder %s536_s19, 1 }
   0xf   : > { %p928_p7 = por %p918_p3, %p55_p2  ;;  %p932_p8 = por %p123_p4, %p49_p0 }
  0x10   : > { %p936_p9 = por %p129_p6, %p55_p2  ;;  %p537_p10 = scmp.ge.s32.totalorder %s852_s17, 1 }
  0x11   : > { %p136_p11 = scmp.lt.s32.totalorder %s852_s17, 3  ;;  %s1138_s1 = sld [smem:[#allocation14_spill]] }
  0x12   : > { %p540_p13 = scmp.ge.s32.totalorder %s852_s17, 2  ;;  %p636_p0 = scmp.lt.s32.totalorder %s852_s17, 2 }
  0x13   : > { %p945_p12 = pnand %p537_p10, %p136_p11  ;;  %s158_s5 = sshll.u32 %s1130_s2, 4  ;;  %s159_s5 = int_to_ptr.vmem [resolvable:$true] %s158_s5 }
  0x14   : > { %p958_p2 = pnand %p636_p0, %p922_p5  ;;  %s854_s7 = smov [#allocation6]  }
  0x15   : > { %p619_p1 = pneg %p945_p12  ;;  %s855_s8 = smov [#allocation7]  }
  0x16   : > { %s33_s9 = sadd.s32 1, %s848_s16  ;;  %s169_s10 = sand.u32 1, %s840_s14  }
  0x17   : > { %s148_s28 = sshll.u32 %s1138_s1, 4  ;;  %p620_p4 = pnand %p619_p1, %p918_p3  ;;  %s149_s28 = int_to_ptr.vmem [resolvable:$true] %s148_s28 }
  0x18   : > { %p35_p6 = scmp.ge.s32.totalorder %s33_s9, 2  ;;  %s541_s11 = sshll.u32 %s169_s10, 3 }
  0x19   : > { %622 = dma.vmem_to_smem (!%p620_p4), %s149_s28, 128, %s854_s7, [#allocation5]  }
  0x1a   : > { %625 = dma.vmem_to_smem (!%p620_p4), %s159_s5, 16, %s855_s8, [#allocation8]  }
  0x1b   : > { %s605_s18 = sshll.u32 %s848_s16, 3  ;;  %s1147_s9 = smov (%p35_p6, %s33_s9), 0 }
  0x1c   : > { %s179_s26 = scalar_lea.hbm %s1128_s0, %s605_s18  ;;  %s37_s27 = ssub.s32 %s848_s16, %s1147_s9 }
  0x1d   : > { %s180_s30 = sshll.u32 %s179_s26, 4  ;;  %p40_p5 = scmp.eq.s32.totalorder %s37_s27, 0  ;;  %s181_s30 = int_to_ptr.hbm [resolvable:$true] %s180_s30 }
  0x1e   : > { %s173_s28 = scalar_lea.vmem [#allocation2], %s541_s11  ;;  %s170_s7 = scalar_lea.sflag [#allocation3], %s169_s10 }
  0x1f   : > { %s182_s4 = sshll.u32 %s173_s28, 4  ;;  %s856_s8 = smov 32   ;;  %s183_s4 = int_to_ptr.vmem [resolvable:$true] %s182_s4 }
  0x20   : > { %s977_s5 = scalar_select %p40_p5, %s840_s14, %s42_s20  }
  0x21   : > { %s857_s1 = smov 2   ;;  %194 = sbr.rel (%p945_p12) target bundleno = 112 (0x70), region = 32 }
  0x22   : > { %629 = dma.hbm_to_vmem [thread:$0]  (!%p958_p2), %s181_s30, 128, %s183_s4, %s170_s7, %s856_s8, %s856_s8, %s857_s1  }
  0x23   : > { %s984_s18 = sand.u32 (!%p945_p12), 1, %s836_s13  }
  0x24   : > { %s545_s11 = sshll.u32 (!%p945_p12), %s984_s18, 3  ;;  %s197_s19 = scalar_lea.sflag (!%p945_p12), [#allocation3], %s984_s18 }
  0x25   : > { %s990_s20 = scalar_lea.vmem (!%p945_p12), [#allocation2], %s545_s11 }
  0x26   : > { %815 = dma.done.wait (%p928_p7), %s197_s19, 128  }
  0x27   : > { %817 = vsyncadd (%p928_p7), %s197_s19, 4294967168 }
  0x28   : > { %819 = dma.done.wait (%p918_p3), [#allocation5], 128  }
  0x29   : > { %821 = vsyncadd (%p918_p3), [#allocation5], 4294967168 }
  0x2a   : > { %823 = dma.done.wait (%p918_p3), [#allocation8], 16  }
  0x2b   : > { %825 = vsyncadd (%p918_p3), [#allocation8], 4294967280 }
  0x2c   : > { %216 = sfence }
  0x2d   : > { %s236_s1 = sld [smem:[#allocation6]]  ;;  %v235_v0 = vld [vmem:[%s990_s20] sm:$0x3]  ;;  %v549_v1 = vld [vmem:[%s990_s20 + $0x2] sm:$0x3]  ;;  %s1019_s19 = scalar_lea.vmem [#allocation9], %s545_s11 }
  0x2e   : > { %s550_s23 = sld [smem:[#allocation6 + $0x1]]  ;;  %v551_v3 = vld [vmem:[%s990_s20 + $0x4] sm:$0x3]  ;;  %v553_v6 = vld [vmem:[%s990_s20 + $0x6] sm:$0x3] }
  0x2f   : > { %s552_s29 = sld [smem:[#allocation6 + $0x2]]  ;;  %v261_v11 = vld [vmem:[%s990_s20] sm:$0x3]  ;;  %v556_v14 = vld [vmem:[%s990_s20 + $0x2] sm:$0x3] }
  0x30   : > { %s554_s6 = sld [smem:[#allocation6 + $0x3]]  ;;  %v558_v16 = vld [vmem:[%s990_s20 + $0x4] sm:$0x3]  ;;  %v560_v20 = vld [vmem:[%s990_s20 + $0x6] sm:$0x3] }
  0x31   : > { %s1005_s10 = sld [smem:[#allocation7]]  ;;  %v285_v32 = vld [vmem:[%s990_s20] sm:$0x3]  ;;  %v565_v34 = vld [vmem:[%s990_s20 + $0x2] sm:$0x3] }
  0x32   : > { %s555_s22 = sld [smem:[#allocation6 + $0x80]]  ;;  %v567_v35 = vld [vmem:[%s990_s20 + $0x4] sm:$0x3]  ;;  %v1029_v38 = vld [vmem:[%s990_s20 + $0x6] sm:$0x3] }
  0x33   : > { %v237_v2 = vstv %s236_s1  ;;  %s557_s21 = sld [smem:[#allocation6 + $0x81]]  ;;  %v348_v57 = vld [vmem:[%s990_s20] sm:$0x3]  ;;  %v583_v59 = vld [vmem:[%s990_s20 + $0x2] sm:$0x3] }
  0x34   : > { %v238_v4 = vmul.f32 %v237_v2, %v235_v0  ;;  %v242_v5 = vstv %s550_s23  ;;  %s559_s26 = sld [smem:[#allocation6 + $0x82]]  ;;  %v585_v62 = vld [vmem:[%s990_s20 + $0x4] sm:$0x3] }
  0x35   : > { %v243_v7 = vmul.f32 %v549_v1, %v242_v5  ;;  %v248_v8 = vstv %s552_s29  ;;  %s561_s27 = sld [smem:[#allocation6 + $0x83]]  ;;  %v1059_v1 = vld [vmem:[%s990_s20 + $0x6] sm:$0x3] }
  0x36   : > { %v249_v9 = vmul.f32 %v551_v3, %v248_v8  ;;  %v254_v10 = vstv %s554_s6  ;;  %s1012_s30 = sld [smem:[#allocation7 + $0x1]] }
  0x37   : > { %v244_v12 = vadd.f32 %v243_v7, %v238_v4  ;;  %v255_v13 = vmul.f32 %v553_v6, %v254_v10  ;;  %v258_v21 = vstv %s1005_s10  ;;  %s571_s28 = sld [smem:[#allocation6 + $0x200]] }
  0x38   : > { %v263_v15 = vstv %s555_s22  ;;  %s572_s4 = sld [smem:[#allocation6 + $0x201]] }
  0x39   : > { %v250_v17 = vadd.f32 %v249_v9, %v244_v12  ;;  %v264_v18 = vmul.f32 %v263_v15, %v261_v11  ;;  %v267_v19 = vstv %s557_s21  ;;  %s573_s7 = sld [smem:[#allocation6 + $0x202]] }
  0x3a   : > { %v268_v22 = vmul.f32 %v556_v14, %v267_v19  ;;  %v272_v23 = vstv %s559_s26  ;;  %s574_s8 = sld [smem:[#allocation6 + $0x203]] }
  0x3b   : > { %v256_v24 = vadd.f32 %v255_v13, %v250_v17  ;;  %v273_v25 = vmul.f32 %v558_v16, %v272_v23  ;;  %v277_v26 = vstv %s561_s27  ;;  %s575_s1 = sld [smem:[#allocation7 + $0x4]] }
  0x3c   : > { %v269_v27 = vadd.f32 %v268_v22, %v264_v18  ;;  %v278_v28 = vmul.f32 %v560_v20, %v277_v26  ;;  %v281_v31 = vstv %s1012_s30  ;;  %s1026_s23 = sld [smem:[#allocation6 + $0x300]] }
  0x3d   : > { %v259_v29 = vadd.f32 %v258_v21, %v256_v24  ;;  %v305_v36 = vstv %s571_s28  ;;  %s577_s29 = sld [smem:[#allocation6 + $0x301]] }
  0x3e   : > { %v274_v30 = vadd.f32 %v273_v25, %v269_v27  ;;  %v306_v39 = vmul.f32 %v305_v36, %v285_v32  ;;  %v308_v40 = vstv %s572_s4  ;;  %s1031_s11 = sld [smem:[#allocation6 + $0x100]] }
  0x3f   : > { %260 = vst [vmem:[%s1019_s19] sm:$0x3] %v259_v29  ;;  %v309_v41 = vmul.f32 %v565_v34, %v308_v40  ;;  %v312_v42 = vstv %s573_s7  ;;  %s566_s6 = sld [smem:[#allocation6 + $0x101]] }
  0x40   : > { %v279_v33 = vadd.f32 %v278_v28, %v274_v30  ;;  %v313_v43 = vmul.f32 %v567_v35, %v312_v42  ;;  %v316_v44 = vstv %s574_s8  ;;  %s1034_s10 = sld [smem:[#allocation6 + $0x102]] }
  0x41   : > { %v310_v45 = vadd.f32 %v309_v41, %v306_v39  ;;  %v317_v46 = vmul.f32 %v1029_v38, %v316_v44  ;;  %s1037_s22 = sld [smem:[#allocation6 + $0x302]]  ;;  %v320_v48 = vstv %s575_s1 }
  0x42   : > { %v282_v37 = vadd.f32 %v281_v31, %v279_v33  ;;  %s1039_s21 = sld [smem:[#allocation6 + $0x103]]  ;;  %v323_v50 = vstv %s1026_s23 }
  0x43   : > { %v314_v47 = vadd.f32 %v313_v43, %v310_v45  ;;  %s1041_s26 = sld [smem:[#allocation6 + $0x303]]  ;;  %v326_v51 = vstv %s577_s29  ;;  %v324_v55 = vmul.f32 %v323_v50, %v285_v32 }
  0x44   : > { %563 = vst [vmem:[%s1019_s19 + $0x2] sm:$0x3] %v282_v37  ;;  %s589_s27 = sld [smem:[#allocation6 + $0x280]]  ;;  %v287_v53 = vstv %s1031_s11  ;;  %v327_v56 = vmul.f32 %v565_v34, %v326_v51 }
  0x45   : > { %v318_v49 = vadd.f32 %v317_v46, %v314_v47  ;;  %s590_s30 = sld [smem:[#allocation6 + $0x281]]  ;;  %v291_v54 = vstv %s566_s6  ;;  %v288_v60 = vmul.f32 %v287_v53, %v285_v32 }
  0x46   : > { %s591_s28 = sld [smem:[#allocation6 + $0x282]]  ;;  %v292_v61 = vmul.f32 %v565_v34, %v291_v54  ;;  %v296_v0 = vstv %s1034_s10  ;;  %v328_v4 = vadd.f32 %v327_v56, %v324_v55 }
  0x47   : > { %v321_v52 = vadd.f32 %v320_v48, %v318_v49  ;;  %s1045_s4 = sld [smem:[#allocation6 + $0x283]]  ;;  %v330_v58 = vstv %s1037_s22  ;;  %v297_v13 = vmul.f32 %v567_v35, %v296_v0 }
  0x48   : > { %s1047_s7 = sld [smem:[#allocation7 + $0x6]]  ;;  %v331_v5 = vmul.f32 %v567_v35, %v330_v58  ;;  %v293_v12 = vadd.f32 %v292_v61, %v288_v60  ;;  %v301_v16 = vstv %s1039_s21 }
  0x49   : > { %694 = vtanh.f32 %v321_v52  ;;  %s1052_s8 = sld [smem:[#allocation7 + $0x5]]  ;;  %v334_v8 = vstv %s1041_s26  ;;  %v302_v24 = vmul.f32 %v1029_v38, %v301_v16  ;;  %s606_s26 = sshll.u32 %s844_s15, 3 }
  0x4a   : > { %v368_v63 = vstv %s589_s27  ;;  %s1055_s1 = sld [smem:[#allocation6 + $0x380]]  ;;  %v332_v18 = vadd.f32 %v331_v5, %v328_v4  ;;  %v335_v19 = vmul.f32 %v1029_v38, %v334_v8  ;;  %v298_v23 = vadd.f32 %v297_v13, %v293_v12 }
  0x4b   : > { %v369_v2 = vmul.f32 %v368_v63, %v348_v57  ;;  %v371_v3 = vstv %s590_s30  ;;  %s1061_s23 = sld [smem:[#allocation6 + $0x381]] }
  0x4c   : > { %s1063_s29 = sld [smem:[#allocation6 + $0x180]]  ;;  %v372_v6 = vmul.f32 %v583_v59, %v371_v3  ;;  %v375_v7 = vstv %s591_s28  ;;  %v336_v28 = vadd.f32 %v335_v19, %v332_v18  ;;  %v303_v33 = vadd.f32 %v302_v24, %v298_v23  ;;  %s424_s28 = scalar_lea.hbm %s1131_s3, %s606_s26 }
  0x4d   : > { %s1066_s11 = sld [smem:[#allocation6 + $0x181]]  ;;  %v376_v9 = vmul.f32 %v585_v62, %v375_v7  ;;  %v379_v10 = vstv %s1045_s4  ;;  %s425_s4 = sshll.u32 %s1019_s19, 4  ;;  %s426_s4 = int_to_ptr.vmem [resolvable:$true] %s425_s4 }
  0x4e   : > { %v373_v14 = vadd.f32 %v372_v6, %v369_v2  ;;  %v380_v15 = vmul.f32 %v1059_v1, %v379_v10  ;;  %s1071_s20 = sld [smem:[#allocation6 + $0x382]]  ;;  %v338_v30 = vstv %s1047_s7  ;;  %s427_s7 = sshll.u32 %s424_s28, 4  ;;  %s428_s7 = int_to_ptr.hbm [resolvable:$true] %s427_s7 }
  0x4f   : > { %v695_v11 = vpop.eup %694  ;;  %s1074_s6 = sld [smem:[#allocation6 + $0x182]]  ;;  %v383_v22 = vstv %s1052_s8  ;;  %v339_v37 = vadd.f32 %v338_v30, %v336_v28  ;;  %s412_s8 = scalar_lea.sflag [#allocation4], %s984_s18 }
  0x50   : > { %v341_v17 = vmul.f32 0.8, %v695_v11  ;;  %v377_v20 = vadd.f32 %v376_v9, %v373_v14  ;;  %v386_v26 = vstv %s1055_s1  ;;  %s597_s10 = sld [smem:[#allocation6 + $0x383]]  ;;  %s776_s15 = sshra.s32 %s428_s7, 4  ;;  %s777_s15 = int_to_ptr.hbm [resolvable:$true] %s776_s15 }
  0x51   : > { %v389_v27 = vstv %s1061_s23  ;;  %s588_s22 = sld [smem:[#allocation6 + $0x183]]  ;;  %v387_v34 = vmul.f32 %v386_v26, %v348_v57  ;;  %s778_s1 = scalar_lea.hbm %s777_s15, 8 }
  0x52   : > { %v342_v21 = vmul.f32 1.442695, %v341_v17  ;;  %v381_v25 = vadd.f32 %v380_v15, %v377_v20  ;;  %v350_v31 = vstv %s1063_s29  ;;  %v390_v35 = vmul.f32 %v583_v59, %v389_v27  ;;  %s598_s21 = sld [smem:[#allocation7 + $0x7]]  ;;  %p779_p3 = scmp.ne.s32.totalorder %s777_s15, %s778_s1 }
  0x53   : > { %v354_v32 = vstv %s1066_s11  ;;  %v351_v38 = vmul.f32 %v350_v31, %v348_v57  ;;  %s782_s11 = scalar_lea.hbm %s1131_s3, 16  ;;  %p783_p11 = scmp.lt.s32.totalorder %s777_s15, %s1131_s3 }
  0x54   : > { %696 = vpow2.f32 %v342_v21  ;;  %v384_v29 = vadd.f32 %v383_v22, %v381_v25  ;;  %v393_v36 = vstv %s1071_s20  ;;  %v355_v39 = vmul.f32 %v583_v59, %v354_v32  ;;  %p780_p7 = pnand %p779_p3, %p932_p8  ;;  %p784_p12 = scmp.lt.s32.totalorder %s782_s11, %s778_s1 }
  0x55   : > { %v359_v41 = vstv %s1074_s6  ;;  %v391_v43 = vadd.f32 %v390_v35, %v387_v34  ;;  %v394_v44 = vmul.f32 %v585_v62, %v393_v36 }
  0x56   : > { %698 = vtanh.f32 %v384_v29  ;;  %v397_v45 = vstv %s597_s10  ;;  %v356_v48 = vadd.f32 %v355_v39, %v351_v38  ;;  %v360_v49 = vmul.f32 %v585_v62, %v359_v41  ;;  %p781_p10 = pneg %p780_p7  ;;  %p785_p0 = por %p784_p12, %p783_p11 }
  0x57   : > { %v364_v50 = vstv %s588_s22  ;;  %v395_v52 = vadd.f32 %v394_v44, %v391_v43  ;;  %v398_v53 = vmul.f32 %v1059_v1, %v397_v45 }
  0x58   : > { %v361_v55 = vadd.f32 %v360_v49, %v356_v48  ;;  %v365_v56 = vmul.f32 %v1059_v1, %v364_v50  ;;  %v401_v58 = vstv %s598_s21  ;;  %p786_p1 = pnand %p785_p0, %p781_p10 }
  0x59   : > { %v399_v57 = vadd.f32 %v398_v53, %v395_v52 }
  0x5a   : > { %v697_v40 = vpop.eup %696  ;;  %v366_v59 = vadd.f32 %v365_v56, %v361_v55 }
  0x5b   : > { %v344_v42 = vmul.f32 %v697_v40, %v303_v33  ;;  %v402_v60 = vadd.f32 %v401_v58, %v399_v57 }
  0x5c   : > { %v699_v46 = vpop.eup %698 }
  0x5d   : > { %v345_v47 = vadd.f32 %v344_v42, %v339_v37  ;;  %v404_v51 = vmul.f32 0.8, %v699_v46 }
  0x5f   : > { %581 = vst [vmem:[%s1019_s19 + $0x4] sm:$0x3] %v345_v47  ;;  %v405_v54 = vmul.f32 1.442695, %v404_v51 }
  0x61   : > { %700 = vpow2.f32 %v405_v54 }
  0x67   : > { %v701_v61 = vpop.eup %700 }
  0x68   : > { %v407_v62 = vmul.f32 %v701_v61, %v366_v59 }
  0x6a   : > { %v408_v63 = vadd.f32 %v407_v62, %v402_v60 }
  0x6c   : > { %599 = vst [vmem:[%s1019_s19 + $0x6] sm:$0x3] %v408_v63 }
  0x6d   : > { %789 = shalt.err (!%p786_p1)
}
  0x6e   : > { %s858_s18 = smov 32   ;;  %s859_s19 = smov 2  }
  0x6f   : > { %617 = dma.vmem_to_hbm [thread:$0]  (%p932_p8), %s426_s4, 128, %s428_s7, %s412_s8, %s858_s18, %s858_s18, %s859_s19  }
  0x70 PF: > { %s442_s10 = sand.u32 1, %s832_s12   ;;  %p631_p2 = pnand %p540_p13, %p936_p9 }
  0x71   : > { %s443_s22 = scalar_lea.sflag [#allocation4], %s442_s10 }
  0x72   : > { %p632_p4 = pneg %p631_p2 }
  0x74   : > { %827 = dma.done.wait (%p632_p4), %s443_s22, 128  }
  0x75   : > { %829 = vsyncadd (%p632_p4), %s443_s22, 4294967168  ;;  %s21_s17 = sadd.s32 1, %s852_s17   ;;  %s1141_s12 = smov %s836_s13 }
  0x76   : > { %p18_p6 = scmp.ge.s32.totalorder %s21_s17, 4   ;;  %s1142_s13 = smov %s840_s14 }
  0x77   : > { %s1143_s14 = smov %s977_s5  ;;  %s1144_s15 = smov %s848_s16 }
  0x78   : > { %s1145_s16 = smov %s1147_s9  ;;  %20 = sbr.rel (!%p18_p6) target bundleno = 10 (0xa), region = 92 }
  0x7d   :  { %449 = vsyncpa [#allocation3], 1 }
  0x7e   :  { %451 = vsyncpa [#allocation3 + $0x1], 1 }
  0x7f   :  { %452 = vsyncpa [#allocation4], 1 }
  0x80   :  { %454 = vsyncpa [#allocation4 + $0x1], 1 }
  0x81   :  { %455 = vsyncpa [#allocation5], 1 }
  0x82   :  { %457 = vsyncpa [#allocation5 + $0x1], 1 }
  0x83   :  { %458 = vsyncpa [#allocation8], 1 }

</bundles_post_ra>
